<compile_context>
chip_gen: v7x
topology: tpu7x:2x2x1
jax: 0.10.0
libtpu: 0.0.40
codegen_flags: <defaults>
</compile_context>

<pallas_src>
import jax
import jax.numpy as jnp
from jax.experimental import pallas as pl
from jax.experimental.pallas import tpu as pltpu

_LANE = 128
_SUBLANE = 8
_REDUCE_TILE_ROWS = 1024   # 3 streams x 2 bufs x 1024*128*4B = 3 MiB  (all gens)
_NONE_TILE_ROWS = 512      # 4 streams x 2 bufs x  512*128*4B = 2 MiB  (all gens)
_VMEM_LIMIT_BYTES = 32 * 1024 * 1024


# --------------------------------------------------------------------------
# layout helpers
# --------------------------------------------------------------------------

def _to_rows128(x):
    """Flatten to (rows, 128).

    The reshape is free (contiguous bitcast).  A padding copy is only made
    when numel % 128 != 0 — for typical NCHW image tensors this never fires.
    """
    flat = x.reshape(-1)
    n = flat.shape[0]
    rows = pl.cdiv(n, _LANE)
    pad = rows * _LANE - n
    if pad:
        flat = jnp.pad(flat, (0, pad))
    return flat.reshape(rows, _LANE), n, pad


def _pick_tile(rows, max_rows):
    """Fixed-size tile (multiple of 8), shrunk only for tiny inputs."""
    return min(max_rows, pl.cdiv(rows, _SUBLANE) * _SUBLANE)


# --------------------------------------------------------------------------
# kernels
# --------------------------------------------------------------------------

def _make_none_kernel(square, weighted, scale):
    """Elementwise loss ('none' reduction); loss_weight folded in."""

    def _elem(p, t):
        d = p.astype(jnp.float32) - t.astype(jnp.float32)
        return d * d if square else jnp.abs(d)

    if not weighted:
        def kernel(p_ref, t_ref, o_ref):
            v = _elem(p_ref[...], t_ref[...])
            if scale != 1.0:
                v = v * scale
            o_ref[...] = v.astype(o_ref.dtype)
        return kernel

    def kernel(p_ref, t_ref, w_ref, o_ref):
        v = _elem(p_ref[...], t_ref[...]) * w_ref[...].astype(jnp.float32)
        if scale != 1.0:
            v = v * scale
        o_ref[...] = v.astype(o_ref.dtype)
    return kernel


def _make_reduce_kernel(square, weighted, need_wsum, tile, rows, need_mask):
    """Sum-reduction kernel over a 1-D grid of row-tiles.

    The (8,128) f32 output block(s) are resident across the whole grid
    (index_map always returns block (0,0)) and serve as the accumulators:
    per step only VPU adds; the cross-lane reduce happens in the wrapper.
    """

    def _elem(p, t):
        d = p.astype(jnp.float32) - t.astype(jnp.float32)
        return d * d if square else jnp.abs(d)

    def _mask(k, v):
        if not need_mask:
            return v
        remaining = rows - k * tile
        rid = jax.lax.broadcasted_iota(jnp.int32, v.shape, 0)
        # jnp.where (not multiply) so stale/garbage tail data never poisons
        # the accumulator with NaN/Inf.
        return jnp.where(rid < remaining, v, 0.0)

    def _fold(v):
        # (tile,128) -> (tile//8, 8, 128) is layout-free; sum over vregs is
        # pure VPU work (no cross-lane traffic).
        return v.reshape(-1, _SUBLANE, _LANE).sum(axis=0)

    if not weighted:
        def kernel(p_ref, t_ref, o_ref):
            k = pl.program_id(0)

            @pl.when(k == 0)
            def _init():
                o_ref[...] = jnp.zeros_like(o_ref)

            v = _mask(k, _elem(p_ref[...], t_ref[...]))
            o_ref[...] += _fold(v)
        return kernel

    if need_wsum:
        def kernel(p_ref, t_ref, w_ref, o_ref, wo_ref):
            k = pl.program_id(0)

            @pl.when(k == 0)
            def _init():
                o_ref[...] = jnp.zeros_like(o_ref)
                wo_ref[...] = jnp.zeros_like(wo_ref)

            w = w_ref[...].astype(jnp.float32)
            v = _mask(k, _elem(p_ref[...], t_ref[...]) * w)
            o_ref[...] += _fold(v)
            wo_ref[...] += _fold(_mask(k, w))
        return kernel

    def kernel(p_ref, t_ref, w_ref, o_ref):
        k = pl.program_id(0)

        @pl.when(k == 0)
        def _init():
            o_ref[...] = jnp.zeros_like(o_ref)

        w = w_ref[...].astype(jnp.float32)
        v = _mask(k, _elem(p_ref[...], t_ref[...]) * w)
        o_ref[...] += _fold(v)
    return kernel


# --------------------------------------------------------------------------
# generic weighted loss (basicsr weighted_loss / weight_reduce_loss semantics)
# --------------------------------------------------------------------------

def _pallas_weighted_loss(pred, target, weight=None, *, square=False,
                          loss_weight=1.0, reduction='mean'):
    if reduction not in ('none', 'mean', 'sum'):
        raise ValueError(f'Unsupported reduction mode: {reduction}.')
    assert pred.shape == target.shape
    orig_shape = pred.shape
    loss_weight = float(loss_weight)

    p2, n_elem, pad = _to_rows128(pred)
    t2, _, _ = _to_rows128(target)
    rows = p2.shape[0]

    weighted = weight is not None
    if weighted:
        w = weight
        if w.shape != orig_shape:
            # TODO(synk): broadcast small weights (e.g. (N,1,H,W)) inside the
            # kernel instead of materializing a full-size HBM copy.
            w = jnp.broadcast_to(w, orig_shape)
        w2, _, _ = _to_rows128(w)

    cparams = lambda sem: pltpu.CompilerParams(
        dimension_semantics=sem, vmem_limit_bytes=_VMEM_LIMIT_BYTES)

    # ---------------- 'none' ----------------
    if reduction == 'none':
        tile = _pick_tile(rows, _NONE_TILE_ROWS)
        grid = (pl.cdiv(rows, tile),)
        blk = pl.BlockSpec((tile, _LANE), lambda i: (i, 0))
        kernel = _make_none_kernel(square, weighted, loss_weight)
        ins = (p2, t2, w2) if weighted else (p2, t2)
        out = pl.pallas_call(
            kernel,
            out_shape=jax.ShapeDtypeStruct((rows, _LANE), pred.dtype),
            grid=grid,
            in_specs=[blk] * len(ins),
            out_specs=blk,
            compiler_params=cparams(("parallel",)),
        )(*ins)
        out = out.reshape(-1)
        if pad:
            out = out[:n_elem]
        return out.reshape(orig_shape)

    # ---------------- 'sum' / 'mean' ----------------
    tile = _pick_tile(rows, _REDUCE_TILE_ROWS)
    grid = (pl.cdiv(rows, tile),)
    need_mask = (rows % tile) != 0
    blk = pl.BlockSpec((tile, _LANE), lambda k: (k, 0))
    acc_spec = pl.BlockSpec((_SUBLANE, _LANE), lambda k: (0, 0))
    need_wsum = weighted and reduction == 'mean'
    kernel = _make_reduce_kernel(square, weighted, need_wsum,
                                 tile, rows, need_mask)
    params = cparams(("arbitrary",))
    acc_shape = jax.ShapeDtypeStruct((_SUBLANE, _LANE), jnp.float32)

    if not weighted:
        acc = pl.pallas_call(
            kernel, out_shape=acc_shape, grid=grid,
            in_specs=[blk, blk], out_specs=acc_spec,
            compiler_params=params,
        )(p2, t2)
        s = jnp.sum(acc)
        if reduction == 'mean':
            s = s / jnp.float32(n_elem)
    elif need_wsum:
        acc, wacc = pl.pallas_call(
            kernel, out_shape=(acc_shape, acc_shape), grid=grid,
            in_specs=[blk, blk, blk], out_specs=(acc_spec, acc_spec),
            compiler_params=params,
        )(p2, t2, w2)
        # basicsr 'mean': divide by sum of the (broadcast) weight
        s = jnp.sum(acc) / jnp.sum(wacc)
    else:  # weighted 'sum'
        acc = pl.pallas_call(
            kernel, out_shape=acc_shape, grid=grid,
            in_specs=[blk, blk, blk], out_specs=acc_spec,
            compiler_params=params,
        )(p2, t2, w2)
        s = jnp.sum(acc)

    return (loss_weight * s).astype(pred.dtype)


def l1_loss_pallas(pred, target, weight=None, *, loss_weight=1.0,
                   reduction='mean'):
    """basicsr L1Loss.forward equivalent."""
    return _pallas_weighted_loss(pred, target, weight, square=False,
                                 loss_weight=loss_weight, reduction=reduction)


def mse_reduce_pallas(pred, target, *, loss_weight=1.0, reduction='mean'):
    """loss_weight * reduce(F.mse_loss(pred, target, 'none'), reduction)."""
    return _pallas_weighted_loss(pred, target, None, square=True,
                                 loss_weight=loss_weight, reduction=reduction)


# --------------------------------------------------------------------------
# VGG16 feature extractor (up to relu3_3) — plain JAX conv stack
# --------------------------------------------------------------------------
# TODO(synk): pretrained torchvision VGG16 weights cannot be loaded in a
# self-contained script; a deterministic, randomly-initialised conv stack with
# the same topology (vgg16.features[:16]) stands in for the frozen extractor.

_VGG_CFG_RELU3_3 = [(3, 64), (64, 64), 'M',
                    (64, 128), (128, 128), 'M',
                    (128, 256), (256, 256), (256, 256)]


def init_vgg_relu3_3_params(key):
    params = []
    for item in _VGG_CFG_RELU3_3:
        if item == 'M':
            continue
        cin, cout = item
        key, kw = jax.random.split(key)
        w = jax.random.normal(kw, (cout, cin, 3, 3), jnp.float32)
        w = w * ((cin * 9) ** -0.5)
        b = jnp.zeros((cout,), jnp.float32)
        params.append((w, b))
    return params


def vgg16_relu3_3_features(x, params):
    x = x.astype(jnp.float32)
    idx = 0
    for item in _VGG_CFG_RELU3_3:
        if item == 'M':
            x = jax.lax.reduce_window(x, -jnp.inf, jax.lax.max,
                                      (1, 1, 2, 2), (1, 1, 2, 2), 'VALID')
            continue
        w, b = params[idx]
        idx += 1
        x = jax.lax.conv_general_dilated(
            x, w, window_strides=(1, 1), padding='SAME',
            dimension_numbers=('NCHW', 'OIHW', 'NCHW'))
        x = jnp.maximum(x + b[None, :, None, None], 0.0)
    return x


# --------------------------------------------------------------------------
# L1PerceptualLoss.forward equivalent
# --------------------------------------------------------------------------

def l1_perceptual_loss(pred, target, weight=None, *, vgg_params,
                       l1_weight=1.0, perc_weight=0.1, reduction='mean'):
    l1 = l1_loss_pallas(pred, target, weight,
                        loss_weight=l1_weight, reduction=reduction)
    # One batched VGG pass over [pred; target] (better MXU utilisation,
    # single weight stream) instead of two separate passes.
    both = jnp.concatenate([pred, target], axis=0)
    fea = vgg16_relu3_3_features(both, vgg_params)
    n = pred.shape[0]
    pred_fea, target_fea = fea[:n], fea[n:]
    perc = mse_reduce_pallas(pred_fea, target_fea,
                             loss_weight=perc_weight, reduction=reduction)
    return l1 + perc


# --------------------------------------------------------------------------
# demo / self-check
# --------------------------------------------------------------------------

if __name__ == "__main__":
    key = jax.random.PRNGKey(0)
    k1, k2, k3, k4 = jax.random.split(key, 4)

    # VGG expects 3-channel input
    N, C, H, W = 2, 3, 16, 16
    pred = jax.random.normal(k1, (N, C, H, W), dtype=jnp.float32)
    target = jax.random.normal(k2, (N, C, H, W), dtype=jnp.float32)
    weight = jax.random.uniform(k3, (N, C, H, W), dtype=jnp.float32)
    vgg_params = init_vgg_relu3_3_params(k4)

    # default module config: l1_weight=1.0, perc_weight=0.1, reduction='mean'
    total = l1_perceptual_loss(pred, target, weight=None,
                               vgg_params=vgg_params,
                               l1_weight=1.0, perc_weight=0.1,
                               reduction='mean')
    jax.block_until_ready(total)

    # extra L1 paths exercised once
    l1_mean = l1_loss_pallas(pred, target, reduction='mean')
    l1_sum = l1_loss_pallas(pred, target, reduction='sum')
    l1_none = l1_loss_pallas(pred, target, reduction='none')
    l1_wmean = l1_loss_pallas(pred, target, weight, reduction='mean')
    l1_wsum = l1_loss_pallas(pred, target, weight, reduction='sum')
    jax.block_until_ready((l1_mean, l1_sum, l1_none, l1_wmean, l1_wsum))

    # ---------------- plain-JAX references ----------------
    abs_d = jnp.abs(pred - target)
    assert jnp.allclose(l1_mean, abs_d.mean(), rtol=1e-5, atol=1e-5)
    assert jnp.allclose(l1_sum, abs_d.sum(), rtol=1e-5, atol=1e-4)
    assert jnp.allclose(l1_none, abs_d, rtol=1e-6, atol=1e-6)
    assert jnp.allclose(l1_wmean, (abs_d * weight).sum() / weight.sum(),
                        rtol=1e-5, atol=1e-5)
    assert jnp.allclose(l1_wsum, (abs_d * weight).sum(), rtol=1e-5, atol=1e-4)

    pf = vgg16_relu3_3_features(pred, vgg_params)
    tf = vgg16_relu3_3_features(target, vgg_params)
    perc_ref = 0.1 * jnp.mean((pf - tf) ** 2)
    total_ref = abs_d.mean() + perc_ref
    assert jnp.allclose(total, total_ref, rtol=1e-5, atol=1e-5)

    print("KERNEL_OK")
</pallas_src>

<mosaic_0001>
module attributes {stable_mosaic.version = 11 : i64} {
  func.func @kernel(%arg0: i32, %arg1: memref<16x128xf32, #tpu.memory_space<vmem>>, %arg2: memref<16x128xf32, #tpu.memory_space<vmem>>, %arg3: memref<8x128xf32, #tpu.memory_space<vmem>>) attributes {dimension_semantics = [#tpu.dimension_semantics<arbitrary>], iteration_bounds = array<i64: 1>, scalar_prefetch = 0 : i64, scratch_operands = 0 : i64, tpu.core_type = #tpu.core_type<tc>, window_params = [{transform_indices = @transform_0, window_bounds = array<i64: 16, 128>}, {transform_indices = @transform_1, window_bounds = array<i64: 16, 128>}, {pipeline_mode = #tpu.pipeline_mode<synchronous>, transform_indices = @transform_2, window_bounds = array<i64: 8, 128>}]} {
    %c0_i32 = arith.constant 0 : i32
    %0 = arith.cmpi eq, %arg0, %c0_i32 : i32
    %1 = arith.extui %0 : i1 to i32
    %c0_i32_0 = arith.constant 0 : i32
    %2 = arith.cmpi ne, %1, %c0_i32_0 : i32
    scf.if %2 {
      %cst_9 = arith.constant 0.000000e+00 : f32
      %19 = vector.broadcast %cst_9 : f32 to vector<8x128xf32>
      %c0_10 = arith.constant 0 : index
      %c0_11 = arith.constant 0 : index
      %20 = vector.load %arg3[%c0_10, %c0_11] : memref<8x128xf32, #tpu.memory_space<vmem>>, vector<8x128xf32>
      tpu.vector_store %arg3[%c0_10, %c0_11], %19 {strides = array<i32>} : memref<8x128xf32, #tpu.memory_space<vmem>>, vector<8x128xf32>,
    } else {
    }
    %c0 = arith.constant 0 : index
    %c0_1 = arith.constant 0 : index
    %3 = vector.load %arg1[%c0, %c0_1] : memref<16x128xf32, #tpu.memory_space<vmem>>, vector<16x128xf32>
    %c0_2 = arith.constant 0 : index
    %c0_3 = arith.constant 0 : index
    %4 = vector.load %arg2[%c0_2, %c0_3] : memref<16x128xf32, #tpu.memory_space<vmem>>, vector<16x128xf32>
    %5 = arith.subf %3, %4 : vector<16x128xf32>
    %6 = math.absf %5 : vector<16x128xf32>
    %c16_i32 = arith.constant 16 : i32
    %7 = arith.muli %arg0, %c16_i32 : i32
    %c12_i32 = arith.constant 12 : i32
    %8 = arith.subi %c12_i32, %7 : i32
    %9 = tpu.iota {dimensions = array<i32: 0>} : vector<16x128xi32>
    %10 = vector.broadcast %8 : i32 to vector<16x128xi32>
    %11 = arith.cmpi slt, %9, %10 : vector<16x128xi32>
    %cst = arith.constant 0.000000e+00 : f32
    %12 = vector.broadcast %cst : f32 to vector<16x128xf32>
    %13 = arith.select %11, %6, %12 : vector<16x128xi1>, vector<16x128xf32>
    %c0_4 = arith.constant 0 : index
    %c0_5 = arith.constant 0 : index
    %14 = vector.load %arg3[%c0_4, %c0_5] : memref<8x128xf32, #tpu.memory_space<vmem>>, vector<8x128xf32>
    %15 = vector.shape_cast %13 : vector<16x128xf32> to vector<2x8x128xf32>
    %cst_6 = arith.constant dense<0.000000e+00> : vector<8x128xf32>
    %16 = vector.multi_reduction <add>, %15, %cst_6 [0] : vector<2x8x128xf32> to vector<8x128xf32>
    %17 = arith.addf %14, %16 : vector<8x128xf32>
    %c0_7 = arith.constant 0 : index
    %c0_8 = arith.constant 0 : index
    %18 = vector.load %arg3[%c0_7, %c0_8] : memref<8x128xf32, #tpu.memory_space<vmem>>, vector<8x128xf32>
    tpu.vector_store %arg3[%c0_7, %c0_8], %17 {strides = array<i32>} : memref<8x128xf32, #tpu.memory_space<vmem>>, vector<8x128xf32>,
    return
  }
  func.func @transform_0(%arg0: i32) -> (i32, i32) {
    %c0_i32 = arith.constant 0 : i32
    %c0_i32_0 = arith.constant 0 : i32
    return %arg0, %c0_i32 : i32, i32
  }
  func.func @transform_1(%arg0: i32) -> (i32, i32) {
    %c0_i32 = arith.constant 0 : i32
    %c0_i32_0 = arith.constant 0 : i32
    return %arg0, %c0_i32 : i32, i32
  }
  func.func @transform_2(%arg0: i32) -> (i32, i32) {
    %c0_i32 = arith.constant 0 : i32
    %c0_i32_0 = arith.constant 0 : i32
    %c0_i32_1 = arith.constant 0 : i32
    return %c0_i32, %c0_i32_0 : i32, i32
  }
}

</mosaic_0001>

<bundles_post_ra>
// kernel: tpu_custom_call.1
= control target key start
LH: loop header
LB: loop body
LE: loop exit
PB: predicated region body
PF: predicated region fallthrough
CT: control target
= control target key end

     0   :  { %7 = vsyncpa [#allocation3], 0  ;;  %s217_s0 = inlined_call_operand.hbm [shape: f32[12,128], index: 0, kind: input, shape index: {}]   ;;  %s218_s1 = inlined_call_operand.hbm [shape: f32[12,128], index: 1, kind: input, shape index: {}]   ;;  %s219_s2 = inlined_call_operand.hbm [shape: f32[8,128], index: 2, kind: output, shape index: {}]  }
   0x1   :  { %8 = vsyncpa [#allocation6], 0 }
   0x2   :  { %9 = vsyncpa [#allocation4], 0  ;;  %s161_s9 = smov [#allocation2]   ;;  %s89_s13 = scalar_lea.hbm %s217_s0, 256 }
   0x3   :  { %s15_s10 = sshll.u32 %s161_s9, 4  ;;  %p90_p0 = scmp.ne.s32.totalorder %s217_s0, %s89_s13  ;;  %s16_s10 = int_to_ptr.vmem [resolvable:$true] %s15_s10 }
   0x4   :  { %p93_p1 = scmp.lt.u32.totalorder %s89_s13, %s217_s0 }
   0x6   :  { %p95_p2 = pnand %p93_p1, %p90_p0 }
   0x8   :  { %98 = shalt.err (!%p95_p2)
}
   0x9   :  { %s99_s18 = scalar_lea.vmem %s16_s10, 256  ;;  %p104_p4 = scmp.lt.s32.totalorder %s16_s10, %s16_s10 }
   0xa   :  { %p100_p3 = scmp.ne.s32.totalorder %s16_s10, %s99_s18  ;;  %p105_p5 = scmp.lt.s32.totalorder %s99_s18, %s99_s18 }
   0xc   :  { %p106_p6 = por %p105_p5, %p104_p4 }
   0xe   :  { %p107_p7 = pnand %p106_p6, %p100_p3 }
  0x10   :  { %110 = shalt.err (!%p107_p7)
}
  0x11   :  { %s162_s19 = smov 128   ;;  %s163_s20 = smov 8  }
  0x12   :  { %21 = dma.hbm_to_vmem [thread:$0]  %s217_s0, 256, %s16_s10, [#allocation3], %s162_s19, %s162_s19, %s163_s20  }
  0x13   :  { %s164_s23 = smov [#allocation5]   ;;  %s111_s27 = scalar_lea.hbm %s218_s1, 256 }
  0x14   :  { %s27_s24 = sshll.u32 %s164_s23, 4  ;;  %p112_p8 = scmp.ne.s32.totalorder %s218_s1, %s111_s27  ;;  %s28_s24 = int_to_ptr.vmem [resolvable:$true] %s27_s24 }
  0x15   :  { %p115_p9 = scmp.lt.u32.totalorder %s111_s27, %s218_s1 }
  0x17   :  { %p117_p10 = pnand %p115_p9, %p112_p8 }
  0x19   :  { %120 = shalt.err (!%p117_p10)
}
  0x1a   :  { %s121_s4 = scalar_lea.vmem %s28_s24, 256  ;;  %p126_p12 = scmp.lt.s32.totalorder %s28_s24, %s28_s24 }
  0x1b   :  { %p122_p11 = scmp.ne.s32.totalorder %s28_s24, %s121_s4  ;;  %p127_p13 = scmp.lt.s32.totalorder %s121_s4, %s121_s4 }
  0x1d   :  { %p128_p0 = por %p127_p13, %p126_p12 }
  0x1f   :  { %p129_p1 = pnand %p128_p0, %p122_p11 }
  0x21   :  { %132 = shalt.err (!%p129_p1)
}
  0x22   :  { %33 = dma.hbm_to_vmem [thread:$0]  %s218_s1, 256, %s28_s24, [#allocation6], %s162_s19, %s162_s19, %s163_s20  }
  0x23   :  { %155 = dma.done.wait [#allocation3], 256  }
  0x24   :  { %156 = vsyncadd [#allocation3], 4294967040 }
  0x25   :  { %157 = dma.done.wait [#allocation6], 256  }
  0x26   :  { %158 = vsyncadd [#allocation6], 4294967040  ;;  %v55_v0 = vlaneseq  ;;  %v45_v3 = vld [vmem:[#allocation2] sm:$0xff]  ;;  %v46_v4 = vld [vmem:[#allocation2 + $0x8] sm:$0xff]  ;;  %s165_s6 = smov [#allocation7]  }
  0x27   :  { %v47_v5 = vld [vmem:[#allocation5] sm:$0xff]  ;;  %v48_v6 = vld [vmem:[#allocation5 + $0x8] sm:$0xff]  ;;  %s73_s7 = sshll.u32 %s165_s6, 4  ;;  %s74_s7 = int_to_ptr.vmem [resolvable:$true] %s73_s7 }
  0x28   :  { %v56_v1 = vshrl.u32 %v55_v0, 7  ;;  %v49_v7 = vsub.f32 %v45_v3, %v47_v5  ;;  %v50_v8 = vsub.f32 %v46_v4, %v48_v6  ;;  %s133_s1 = scalar_lea.vmem %s74_s7, 128  ;;  %p138_p3 = scmp.lt.s32.totalorder %s74_s7, %s74_s7 }
  0x29   :  { %p134_p2 = scmp.ne.s32.totalorder %s74_s7, %s133_s1  ;;  %p139_p4 = scmp.lt.s32.totalorder %s133_s1, %s133_s1 }
  0x2a   :  { %v57_v2 = vadd.s32 8, %v56_v1  ;;  %v51_v9 = vand.u32 2147483647, %v49_v7  ;;  %v52_v10 = vand.u32 2147483647, %v50_v8 }
  0x2b   :  { %p140_p5 = por %p139_p4, %p138_p3 }
  0x2c   :  { %vm60_vm0 = vcmp.lt.s32.totalorder %v57_v2, 12 }
  0x2d   :  { %v62_v11 = vsel %vm60_vm0, %v52_v10, 0.0  ;;  %p141_p6 = pnand %p140_p5, %p134_p2 }
  0x2e   :  { %v64_v12 = vadd.f32 %v62_v11, %v51_v9 }
  0x30   :  { %66 = vst [vmem:[#allocation7] sm:$0xff] %v64_v12 }
  0x31   :  { %144 = shalt.err (!%p141_p6)
}
  0x32   :  { %s145_s10 = scalar_lea.hbm %s219_s2, 128 }
  0x33   :  { %p146_p7 = scmp.ne.s32.totalorder %s219_s2, %s145_s10  ;;  %p149_p8 = scmp.lt.u32.totalorder %s145_s10, %s219_s2 }
  0x35   :  { %p151_p9 = pnand %p149_p8, %p146_p7 }
  0x37   :  { %154 = shalt.err (!%p151_p9)
}
  0x38   :  { %76 = dma.vmem_to_hbm [thread:$0]  %s74_s7, 128, %s219_s2, [#allocation4]  }
  0x39   :  { %159 = dma.done.wait [#allocation4], 128  }
  0x3a   :  { %160 = vsyncadd [#allocation4], 4294967168 }
  0x3b   :  { %80 = vsyncpa [#allocation3], 1 }
  0x3c   :  { %81 = vsyncpa [#allocation6], 1 }
  0x3d   :  { %82 = vsyncpa [#allocation4], 1 }

</bundles_post_ra>
